<compile_context>
chip_gen: v5e
topology: v5e:2x2
jax: 0.10.0
libtpu: 0.0.40
codegen_flags: <defaults>
</compile_context>

<pallas_src>
import math

import numpy as np
import jax
import jax.numpy as jnp
from jax import lax
from jax.experimental import pallas as pl
from jax.experimental.pallas import tpu as pltpu

WIDTH = 64
N_INPUT_DIMS = 64
N_OUTPUT_DIMS = 64

LANES = 128            # two logical batch rows packed per 128-lane row
SUBCHUNK = 256         # packed rows per in-kernel compute chunk (bounds f32 live ranges)
MAX_TILE_ROWS = 8192   # packed rows per grid step (2 MiB in + 2 MiB out, bf16)


# ----------------------------------------------------------------------------
# Packed-layout helpers (identical semantics to the PyTorch reference).
# ----------------------------------------------------------------------------
def to_packed_layout_coord(idx, rows, cols):
    i = idx // cols
    j = idx % cols
    if i % 2 == 0:
        return i * cols + 2 * j
    else:
        return (i - 1) * cols + 2 * j + 1


def unpack_matrix(packed, offset, rows, cols):
    """Return logical row-major (rows, cols) matrix from packed param vector."""
    out = np.empty((rows, cols), dtype=packed.dtype)
    for i in range(rows):
        for j in range(cols):
            out[i, j] = packed[offset + to_packed_layout_coord(i * cols + j, rows, cols)]
    return out


def _round_up(x, m):
    return ((x + m - 1) // m) * m


# ----------------------------------------------------------------------------
# Pallas kernel: fused 2-layer MLP (matmul -> relu -> matmul), lane-dense.
#   x_ref : (tile, 128) bf16   -- two logical batch rows per 128-lane row
#   w_ref : (2, 128, 128) bf16 -- block-diagonal embeddings of the 64x64 weights
#   o_ref : (tile, 128) bf16
# The tile is processed in SUBCHUNK-row pieces so the f32 intermediates never
# exceed ~128 KiB (no large VMEM spill temporaries, keeps vld/vst slots free
# for the pipeline DMAs).
# ----------------------------------------------------------------------------
def fused_mlp_kernel(x_ref, w_ref, o_ref):
    w1 = w_ref[0]                                   # (128, 128) bf16
    w2 = w_ref[1]                                   # (128, 128) bf16
    tile = x_ref.shape[0]                           # static
    sub = min(SUBCHUNK, tile)
    n_sub = tile // sub                             # tile is a multiple of sub

    def body(c, carry):
        r = pl.multiple_of(c * sub, sub)
        x = x_ref[pl.ds(r, sub), :]                                   # (sub,128) bf16
        h = jnp.dot(x, w1, preferred_element_type=jnp.float32)        # (sub,128) f32
        h = jnp.maximum(h, 0.0).astype(jnp.bfloat16)                  # ReLU -> bf16
        out = jnp.dot(h, w2, preferred_element_type=jnp.float32)      # (sub,128) f32
        o_ref[pl.ds(r, sub), :] = out.astype(o_ref.dtype)
        return carry

    lax.fori_loop(0, n_sub, body, 0)


def _choose_tile(rows):
    """Packed-rows-per-grid-step. rows = number of packed (128-lane) rows."""
    if rows <= 2 * SUBCHUNK:
        # Tiny batch: single small block (>=16 sublanes for bf16).
        return _round_up(max(rows, 16), 16)
    # >= 2 grid steps so the "parallel" axis can feed both v7x TensorCores,
    # capped so per-step double-buffered VMEM stays modest on every chip.
    return int(min(MAX_TILE_ROWS, _round_up((rows + 1) // 2, SUBCHUNK)))


def fused_mlp(x, w_stack):
    """x: (B, 64) bf16 -> (B, 64) bf16 via a lane-dense fused MLP kernel."""
    B = x.shape[0]

    if B % 2 != 0:
        # TODO(synk): odd batch needs a one-row pad (whole-tensor copy); rare path.
        x = jnp.pad(x, ((0, 1), (0, 0)))
    rows = x.shape[0] // 2
    x2 = x.reshape(rows, LANES)              # free relayout: 2 batch rows / 128 lanes

    tile = _choose_tile(rows)
    if rows < tile:
        # Only tiny batches hit this; the pad is a few KiB.
        x2 = jnp.pad(x2, ((0, tile - rows), (0, 0)))
    rows_padded = x2.shape[0]

    grid = (pl.cdiv(rows_padded, tile),)     # ragged last block handled by Pallas

    flops = 2 * 2 * rows_padded * LANES * LANES
    bytes_accessed = 2 * rows_padded * LANES * 2 + int(w_stack.size) * 2

    out2 = pl.pallas_call(
        fused_mlp_kernel,
        out_shape=jax.ShapeDtypeStruct((rows_padded, LANES), jnp.bfloat16),
        grid_spec=pltpu.PrefetchScalarGridSpec(
            num_scalar_prefetch=0,
            grid=grid,
            in_specs=[
                pl.BlockSpec((tile, LANES), lambda b: (b, 0)),
                pl.BlockSpec((2, LANES, LANES), lambda b: (0, 0, 0)),  # resident weights
            ],
            out_specs=pl.BlockSpec((tile, LANES), lambda b: (b, 0)),
        ),
        compiler_params=pltpu.CompilerParams(
            dimension_semantics=("parallel",),
            vmem_limit_bytes=32 * 1024 * 1024,
        ),
        cost_estimate=pl.CostEstimate(
            flops=flops, transcendentals=0, bytes_accessed=bytes_accessed
        ),
    )(x2, w_stack)

    return out2.reshape(rows_padded * 2, N_OUTPUT_DIMS)[:B]


# ----------------------------------------------------------------------------
# Module wrapper: deterministic param init + forward.
# ----------------------------------------------------------------------------
class PallasTinyNNModule:
    def __init__(self, key):
        self.width = WIDTH
        self.n_input_dims = N_INPUT_DIMS
        self.n_output_dims = N_OUTPUT_DIMS
        self.n_hidden_layers = 1

        n_params = self.n_input_dims * self.width + self.width * self.n_output_dims
        std = math.sqrt(2.0 / float(self.width + self.width))
        packed = jax.random.normal(key, (n_params,), dtype=jnp.float32) * std
        packed = packed.astype(jnp.bfloat16)

        packed_np = np.asarray(packed.astype(jnp.float32))
        w_in = unpack_matrix(packed_np, 0, self.n_input_dims, self.width)
        w_out = unpack_matrix(packed_np, self.n_input_dims * self.width,
                              self.width, self.n_output_dims)

        # Logical (in_dim, out_dim) weights for reference math.
        self.w1 = jnp.asarray(w_in, dtype=jnp.bfloat16)
        self.w2 = jnp.asarray(w_out, dtype=jnp.bfloat16)

        # Block-diagonal 128x128 embeddings, stacked into a single (2,128,128)
        # resident input (one DMA stream for both weight matrices).
        w1_big = np.zeros((LANES, LANES), dtype=np.float32)
        w1_big[:WIDTH, :WIDTH] = w_in
        w1_big[WIDTH:, WIDTH:] = w_in
        w2_big = np.zeros((LANES, LANES), dtype=np.float32)
        w2_big[:WIDTH, :WIDTH] = w_out
        w2_big[WIDTH:, WIDTH:] = w_out
        self.w_stack = jnp.asarray(
            np.stack([w1_big, w2_big], axis=0), dtype=jnp.bfloat16
        )

    def __call__(self, x):
        # x: (batch, n_input_dims) -> (batch, n_output_dims) bf16
        return fused_mlp(x.astype(jnp.bfloat16), self.w_stack)


def _reference(module, x):
    h = jnp.maximum(
        x.astype(jnp.float32) @ module.w1.astype(jnp.float32), 0.0
    ).astype(jnp.bfloat16)
    return (h.astype(jnp.float32) @ module.w2.astype(jnp.float32)).astype(jnp.bfloat16)


if __name__ == "__main__":
    key = jax.random.PRNGKey(0)
    k_params, k_x1, k_x2, k_x3 = jax.random.split(key, 4)

    module = PallasTinyNNModule(k_params)

    def _check(k, batch):
        x = jax.random.normal(k, (batch, N_INPUT_DIMS), dtype=jnp.float32)
        x = x.astype(jnp.bfloat16)
        out = jax.block_until_ready(module(x))
        ref = _reference(module, x)
        np.testing.assert_allclose(
            np.asarray(out, dtype=np.float32),
            np.asarray(ref, dtype=np.float32),
            rtol=2e-2, atol=2e-2,
        )
        assert out.shape == (batch, N_OUTPUT_DIMS)

    _check(k_x1, 16)     # tiny batch: single small block
    _check(k_x2, 33)     # odd batch: exercises 1-row pad path
    _check(k_x3, 2100)   # multi-step grid with ragged last block, no padding

    print("KERNEL_OK")
</pallas_src>

<mosaic_0001>
module attributes {stable_mosaic.version = 11 : i64} {
  func.func @fused_mlp_kernel(%arg0: i32, %arg1: memref<16x128xbf16, #tpu.memory_space<vmem>>, %arg2: memref<2x128x128xbf16, #tpu.memory_space<vmem>>, %arg3: memref<16x128xbf16, #tpu.memory_space<vmem>>) attributes {dimension_semantics = [#tpu.dimension_semantics<parallel>], iteration_bounds = array<i64: 1>, scalar_prefetch = 0 : i64, scratch_operands = 0 : i64, tpu.core_type = #tpu.core_type<tc>, window_params = [{transform_indices = @transform_0, window_bounds = array<i64: 16, 128>}, {pipeline_mode = #tpu.pipeline_mode<synchronous>, transform_indices = @transform_1, window_bounds = array<i64: 2, 128, 128>}, {transform_indices = @transform_2, window_bounds = array<i64: 16, 128>}]} {
    %c0 = arith.constant 0 : index
    %c0_0 = arith.constant 0 : index
    %c0_1 = arith.constant 0 : index
    %0 = vector.load %arg2[%c0, %c0_0, %c0_1] : memref<2x128x128xbf16, #tpu.memory_space<vmem>>, vector<1x128x128xbf16>
    %1 = vector.shape_cast %0 : vector<1x128x128xbf16> to vector<128x128xbf16>
    %c1 = arith.constant 1 : index
    %c0_2 = arith.constant 0 : index
    %c0_3 = arith.constant 0 : index
    %2 = vector.load %arg2[%c1, %c0_2, %c0_3] : memref<2x128x128xbf16, #tpu.memory_space<vmem>>, vector<1x128x128xbf16>
    %3 = vector.shape_cast %2 : vector<1x128x128xbf16> to vector<128x128xbf16>
    %c0_i32 = arith.constant 0 : i32
    %c16_i32 = arith.constant 16 : i32
    %4 = arith.muli %c0_i32, %c16_i32 : i32
    %5 = tpu.assume_multiple %4, 16 : i32
    %6 = arith.index_cast %5 : i32 to index
    %c0_4 = arith.constant 0 : index
    %7 = vector.load %arg1[%6, %c0_4] : memref<16x128xbf16, #tpu.memory_space<vmem>>, vector<16x128xbf16>
    %cst = arith.constant dense<0.000000e+00> : vector<16x128xf32>
    %8 = tpu.matmul %7, %1, %cst {dimension_numbers = #tpu.dot_dimension_numbers<[1], [0], [0], [1], [0, 0, 1, 1], [], []>} : vector<16x128xbf16>, vector<128x128xbf16>, vector<16x128xf32> -> vector<16x128xf32>
    %cst_5 = arith.constant 0.000000e+00 : f32
    %9 = vector.broadcast %cst_5 : f32 to vector<16x128xf32>
    %10 = arith.maximumf %8, %9 : vector<16x128xf32>
    %11 = arith.truncf %10 : vector<16x128xf32> to vector<16x128xbf16>
    %cst_6 = arith.constant dense<0.000000e+00> : vector<16x128xf32>
    %12 = tpu.matmul %11, %3, %cst_6 {dimension_numbers = #tpu.dot_dimension_numbers<[1], [0], [0], [1], [0, 0, 1, 1], [], []>} : vector<16x128xbf16>, vector<128x128xbf16>, vector<16x128xf32> -> vector<16x128xf32>
    %13 = arith.truncf %12 : vector<16x128xf32> to vector<16x128xbf16>
    %14 = arith.index_cast %5 : i32 to index
    %c0_7 = arith.constant 0 : index
    %15 = vector.load %arg3[%14, %c0_7] : memref<16x128xbf16, #tpu.memory_space<vmem>>, vector<16x128xbf16>
    tpu.vector_store %arg3[%14, %c0_7], %13 {strides = array<i32>} : memref<16x128xbf16, #tpu.memory_space<vmem>>, vector<16x128xbf16>,
    %c1_i32 = arith.constant 1 : i32
    return
  }
  func.func @transform_0(%arg0: i32) -> (i32, i32) {
    %c0_i32 = arith.constant 0 : i32
    %c0_i32_0 = arith.constant 0 : i32
    return %arg0, %c0_i32 : i32, i32
  }
  func.func @transform_1(%arg0: i32) -> (i32, i32, i32) {
    %c0_i32 = arith.constant 0 : i32
    %c0_i32_0 = arith.constant 0 : i32
    %c0_i32_1 = arith.constant 0 : i32
    %c0_i32_2 = arith.constant 0 : i32
    return %c0_i32, %c0_i32_0, %c0_i32_1 : i32, i32, i32
  }
  func.func @transform_2(%arg0: i32) -> (i32, i32) {
    %c0_i32 = arith.constant 0 : i32
    %c0_i32_0 = arith.constant 0 : i32
    return %arg0, %c0_i32 : i32, i32
  }
}

</mosaic_0001>

<bundles_post_ra>
// kernel: tpu_custom_call.1
= control target key start
LH: loop header
LB: loop body
LE: loop exit
PB: predicated region body
PF: predicated region fallthrough
CT: control target
= control target key end

     0   :  { %7 = vsyncpa [#allocation3], 0  ;;  %s447_s0 = inlined_call_operand.hbm [shape: bf16[16,128], index: 0, kind: input, shape index: {}]   ;;  %s448_s1 = inlined_call_operand.hbm [shape: bf16[2,128,128], index: 1, kind: input, shape index: {}]   ;;  %s449_s2 = inlined_call_operand.hbm [shape: bf16[16,128], index: 2, kind: output, shape index: {}]  }
   0x1   :  { %8 = vsyncpa [#allocation6], 0 }
   0x2   :  { %9 = vsyncpa [#allocation4], 0  ;;  %s14_s11 = sshll.u32 %s447_s0, 4  ;;  %s409_s12 = smov [#allocation2]   ;;  %s15_s11 = int_to_ptr.hbm [resolvable:$true] %s14_s11 }
   0x3   :  { %s16_s13 = sshll.u32 %s409_s12, 4  ;;  %s27_s16 = sshll.u32 %s448_s1, 4  ;;  %s17_s13 = int_to_ptr.vmem [resolvable:$true] %s16_s13  ;;  %s28_s16 = int_to_ptr.hbm [resolvable:$true] %s27_s16 }
   0x4   :  { %s410_s17 = smov 64   ;;  %s411_s18 = smov 4  }
   0x5   :  { %22 = dma.hbm_to_vmem [thread:$0]  %s15_s11, 128, %s17_s13, [#allocation3], %s410_s17, %s410_s17, %s411_s18  }
   0x6   :  { %s412_s19 = smov [#allocation5]  }
   0x7   :  { %s29_s20 = sshll.u32 %s412_s19, 4  ;;  %s30_s20 = int_to_ptr.vmem [resolvable:$true] %s29_s20 }
   0x8   :  { %35 = dma.hbm_to_vmem [thread:$0]  %s28_s16, 2048, %s30_s20, [#allocation6], %s410_s17, %s410_s17, %s411_s18  }
   0x9   :  { %403 = dma.done.wait [#allocation3], 128  }
   0xa   :  { %404 = vsyncadd [#allocation3], 4294967168 }
   0xb   :  { %405 = dma.done.wait [#allocation6], 2048  }
   0xc   :  { %406 = vsyncadd [#allocation6], 4294965248  ;;  %v311_v0 = vld [vmem:[#allocation5 + $0x38] sm:$0xff]  ;;  %v310_v1 = vld [vmem:[#allocation5 + $0x30] sm:$0xff]  ;;  %s413_s0 = smov [#allocation7]   ;;  %s222_s23 = sshll.u32 %s449_s2, 4  ;;  %s223_s23 = int_to_ptr.hbm [resolvable:$true] %s222_s23 }
   0xd   :  { %133 = vmatpush.bf16.msra.mxu0 %v311_v0  ;;  %v319_v2 = vld [vmem:[#allocation5 + $0x78] sm:$0xff]  ;;  %v318_v3 = vld [vmem:[#allocation5 + $0x70] sm:$0xff]  ;;  %v309_v4 = vld [vmem:[#allocation5 + $0x28] sm:$0xff]  ;;  %s220_s1 = sshll.u32 %s413_s0, 4  ;;  %s221_s1 = int_to_ptr.vmem [resolvable:$true] %s220_s1 }
   0xe   :  { %198 = vmatpush.bf16.msra.mxu1 %v319_v2  ;;  %v317_v5 = vld [vmem:[#allocation5 + $0x68] sm:$0xff]  ;;  %v308_v6 = vld [vmem:[#allocation5 + $0x20] sm:$0xff]  ;;  %v307_v8 = vld [vmem:[#allocation5 + $0x18] sm:$0xff] }
   0xf   :  { %v316_v7 = vld [vmem:[#allocation5 + $0x60] sm:$0xff]  ;;  %v315_v9 = vld [vmem:[#allocation5 + $0x58] sm:$0xff]  ;;  %v306_v10 = vld [vmem:[#allocation5 + $0x10] sm:$0xff] }
  0x10   :  { %v305_v11 = vld [vmem:[#allocation5 + $0x8] sm:$0xff]  ;;  %v304_v12 = vld [vmem:[#allocation5] sm:$0xff]  ;;  %v320_v13 = vld [vmem:[#allocation2] sm:$0xff] }
  0x11   :  { %134 = vmatpush.bf16.msra.mxu0 %v310_v1  ;;  %v314_v14 = vld [vmem:[#allocation5 + $0x50] sm:$0xff]  ;;  %v313_v15 = vld [vmem:[#allocation5 + $0x48] sm:$0xff]  ;;  %v312_v16 = vld [vmem:[#allocation5 + $0x40] sm:$0xff] }
  0x12   :  { %199 = vmatpush.bf16.msra.mxu1 %v318_v3 }
  0x15   :  { %135 = vmatpush.bf16.msra.mxu0 %v309_v4 }
  0x16   :  { %200 = vmatpush.bf16.msra.mxu1 %v317_v5 }
  0x19   :  { %136 = vmatpush.bf16.msra.mxu0 %v308_v6 }
  0x1a   :  { %201 = vmatpush.bf16.msra.mxu1 %v316_v7 }
  0x1d   :  { %137 = vmatpush.bf16.msra.mxu0 %v307_v8 }
  0x1e   :  { %202 = vmatpush.bf16.msra.mxu1 %v315_v9 }
  0x21   :  { %138 = vmatpush.bf16.msra.mxu0 %v306_v10 }
  0x22   :  { %203 = vmatpush.bf16.msra.mxu1 %v314_v14 }
  0x25   :  { %139 = vmatpush.bf16.msra.mxu0 %v305_v11 }
  0x26   :  { %204 = vmatpush.bf16.msra.mxu1 %v313_v15 }
  0x29   :  { %140 = vmatpush.bf16.msra.mxu0 %v304_v12 }
  0x2a   :  { %205 = vmatpush.bf16.msra.mxu1 %v312_v16 }
  0x2c   :  { %141 = vmatmul.bf16.vlgmr.msra.gmra.mxu0 %v320_v13 }
  0xa9   :  { %v142_v17 = vpop.f32.mrf.mxu0 }
  0xaa   :  { %v147_v19 = vmax.f32 %v142_v17, 0.0 }
  0xb1   :  { %v144_v18 = vpop.f32.mrf.mxu0 }
  0xb2   :  { %v148_v20 = vmax.f32 %v144_v18, 0.0 }
  0xb4   :  { %v149_v21 = vpack.c.bf16 %v148_v20, %v147_v19 }
  0xb6   :  { %206 = vmatmul.bf16.vlgmr.msra.gmra.mxu1 %v149_v21 }
 0x133   :  { %v207_v22 = vpop.f32.mrf.mxu1 }
 0x13b   :  { %v209_v23 = vpop.f32.mrf.mxu1 }
 0x13c   :  { %v324_v24 = vpack.c.bf16 %v209_v23, %v207_v22 }
 0x13e   :  { %325 = vst [vmem:[#allocation7] sm:$0xff] %v324_v24  }
 0x13f   :  { %228 = dma.vmem_to_hbm [thread:$0]  %s221_s1, 128, %s223_s23, [#allocation4], %s410_s17, %s410_s17, %s411_s18  }
 0x140   :  { %407 = dma.done.wait [#allocation4], 128  }
 0x141   :  { %408 = vsyncadd [#allocation4], 4294967168 }
 0x142   :  { %233 = vsyncpa [#allocation3], 1 }
 0x143   :  { %234 = vsyncpa [#allocation6], 1 }
 0x144   :  { %235 = vsyncpa [#allocation4], 1 }

</bundles_post_ra>
